<compile_context>
chip_gen: v6e
topology: v6e:2x2x1
jax: 0.10.0
libtpu: 0.0.40
codegen_flags: <defaults>
</compile_context>

<pallas_src>
import functools

import jax
import jax.numpy as jnp
from jax import lax
from jax.experimental import pallas as pl
from jax.experimental.pallas import tpu as pltpu


def _round_up(a, b):
    return (a + b - 1) // b * b


_NEG_BIG = -1e30  # finite "-inf" so padded vocab columns never create inf-inf NaNs


# -----------------------------------------------------------------------------
# VMEM budgeting / tile selection
# -----------------------------------------------------------------------------
def _vmem_limit_bytes():
    """Scoped-VMEM limit from the actual chip (v7x: 64 MiB, v5e/v6e: 128 MiB)."""
    try:
        cap = int(pltpu.get_tpu_info().vmem_capacity_bytes)
    except Exception:
        cap = 64 * 1024 * 1024  # conservative (v7x-sized) fallback
    return int(min(max(cap - (8 << 20), 32 << 20), 112 << 20))


def _tile_fits(row_tile, v_tile, hidden, n_rows, budget):
    # 2 heads x double-buffered bf16 activation + weight blocks, f32 accumulators,
    # plus slack for ids / outputs / bias columns / compiler scratch.
    need = (8 * hidden * (row_tile + v_tile)
            + 24 * _round_up(max(n_rows, 1), row_tile)
            + (2 << 20))
    return need <= budget


def prepare_grpo_lm_head(lin_weight, ref_lin_weight, lin_bias=None, ref_lin_bias=None,
                         *, temperature=1.0, max_row_tile=512):
    """One-time LM-head prep: bf16 cast, vocab padding, bias/pad column, tile choice.

    Call this once (outside the step) so the two (V, H) weights are not re-cast /
    re-padded on every forward invocation.
    """
    V, H = lin_weight.shape
    assert ref_lin_weight.shape == (V, H)

    vmem_limit = _vmem_limit_bytes()
    budget = vmem_limit - (4 << 20)

    # Vocab tile: as large as the VMEM budget allows (fewer grid steps and fewer
    # activation re-streams), reserving room for up-to-max_row_tile activations.
    v_tile = 128
    for cand in (4096, 2048, 1024, 512, 256):
        if cand <= _round_up(V, 128) and _tile_fits(max_row_tile, cand, H,
                                                    max_row_tile, budget):
            v_tile = cand
            break
    v_pad = _round_up(V, v_tile)

    def prep_w(w):
        if v_pad != V:
            w = jnp.pad(w, ((0, v_pad - V), (0, 0)))
        return w.astype(jnp.bfloat16)

    inv_t = 1.0 / float(temperature)
    has_bias_col = (v_pad != V) or (lin_bias is not None) or (ref_lin_bias is not None)

    def bias_column(b):
        # Logits are computed as (x / T) @ W^T, so a PyTorch bias b becomes b / T
        # here; padded vocab rows get a finite -BIG so they never win the softmax.
        col = jnp.zeros((v_pad,), jnp.float32)
        if b is not None:
            col = col.at[:V].set(b.astype(jnp.float32) * inv_t)
        if v_pad != V:
            col = col.at[V:].set(_NEG_BIG)
        return col.reshape(v_pad, 1)

    return {
        "weight": prep_w(lin_weight),
        "ref_weight": prep_w(ref_lin_weight),
        "bias_col": bias_column(lin_bias) if has_bias_col else None,
        "ref_bias_col": bias_column(ref_lin_bias) if has_bias_col else None,
        "v_tile": v_tile,
        "v_pad": v_pad,
        "vocab_size": V,
        "hidden": H,
        "temperature": float(temperature),
        "vmem_limit": vmem_limit,
        "max_row_tile": int(max_row_tile),
    }


# -----------------------------------------------------------------------------
# Kernel: fused policy + reference LM-head matmul + online log-softmax + gather
#   per_token_logp[n] = ((x[n]/T) @ W^T + b/T)[ids[n]] - logsumexp((x[n]/T) @ W^T + b/T)
# Grid: (vocab tiles [OUTER, reduction], row tiles [INNER]).
# Each weight tile is DMA'd once; the online-logsumexp state per row tile lives in
# (num_row_tiles, row_tile) VMEM scratch. Logits are computed transposed
# (v_tile, row_tile) so every per-row reduction lands as a lane-dense (1, row_tile)
# vector -> unmasked full-width stores, no in-kernel transpose.
# -----------------------------------------------------------------------------
def _fused_logps_kernel(*refs, has_bias_col):
    if has_bias_col:
        (x_ref, rx_ref, w_ref, rw_ref, ids_ref, bias_p_ref, bias_r_ref,
         out_p_ref, out_r_ref, m_p, l_p, s_p, m_r, l_r, s_r) = refs
    else:
        (x_ref, rx_ref, w_ref, rw_ref, ids_ref,
         out_p_ref, out_r_ref, m_p, l_p, s_p, m_r, l_r, s_r) = refs
        bias_p_ref = bias_r_ref = None

    k = pl.program_id(0)               # vocab tile (outer reduction axis)
    i = pl.program_id(1)               # row tile (inner)
    v_tile = w_ref.shape[0]
    row_tile = ids_ref.shape[1]
    row = pl.ds(i, 1)                  # this row tile's slot in the accumulators

    @pl.when(k == 0)
    def _init():
        neg = jnp.full((1, row_tile), _NEG_BIG, jnp.float32)
        zero = jnp.zeros((1, row_tile), jnp.float32)
        m_p[row, :] = neg
        m_r[row, :] = neg
        l_p[row, :] = zero
        l_r[row, :] = zero
        s_p[row, :] = zero
        s_r[row, :] = zero

    # Shared per-step vectors (computed once, reused by both heads).
    ids = ids_ref[...]                                                  # (1, row_tile)
    vocab_iota = lax.broadcasted_iota(jnp.int32, (v_tile, row_tile), 0) + k * v_tile
    sel_mask = vocab_iota == ids                                        # (v_tile, row_tile)

    def online_update(inp_ref, wt_ref, bias_ref, m_ref, l_ref, s_ref):
        # logits^T: (v_tile, row_tile); bf16 x bf16 -> f32 accumulation on the MXU.
        logits_t = lax.dot_general(
            wt_ref[...], inp_ref[...],
            dimension_numbers=(((1,), (1,)), ((), ())),
            preferred_element_type=jnp.float32)
        if bias_ref is not None:
            logits_t = logits_t + bias_ref[...]        # (v_tile, 1) broadcast add
        tile_max = jnp.max(logits_t, axis=0, keepdims=True)
        m_prev = m_ref[row, :]
        m_new = jnp.maximum(m_prev, tile_max)
        alpha = jnp.exp(m_prev - m_new)
        l_ref[row, :] = alpha * l_ref[row, :] + jnp.sum(
            jnp.exp(logits_t - m_new), axis=0, keepdims=True)
        s_ref[row, :] = s_ref[row, :] + jnp.sum(
            jnp.where(sel_mask, logits_t, 0.0), axis=0, keepdims=True)
        m_ref[row, :] = m_new

    online_update(x_ref, w_ref, bias_p_ref, m_p, l_p, s_p)      # policy head
    online_update(rx_ref, rw_ref, bias_r_ref, m_r, l_r, s_r)    # reference head

    @pl.when(k == pl.num_programs(0) - 1)
    def _finalize():
        out_p_ref[...] = s_p[row, :] - (m_p[row, :] + jnp.log(l_p[row, :]))
        out_r_ref[...] = s_r[row, :] - (m_r[row, :] + jnp.log(l_r[row, :]))


def fused_per_token_logps(x_flat, ref_flat, ids_flat, head):
    """x_flat/ref_flat: (N, H); ids_flat: (N,) int. Returns (policy, ref) logps (N,) f32."""
    N, H = x_flat.shape
    assert H == head["hidden"]
    v_tile, v_pad = head["v_tile"], head["v_pad"]
    vmem_limit = head["vmem_limit"]
    budget = vmem_limit - (4 << 20)

    # Row tile: prefer 512/256 (v6e/v7x MXU is 256 lanes wide); shrink for small N
    # or tight VMEM. Must be a multiple of 128 (lane width of the outputs).
    n128 = _round_up(max(N, 1), 128)
    row_tile = 128
    for cand in (head["max_row_tile"], 256, 128):
        if cand <= max(n128, 128) and _tile_fits(cand, v_tile, H, N, budget):
            row_tile = cand
            break
    n_pad = _round_up(max(N, 1), row_tile)
    num_row_tiles = n_pad // row_tile
    num_v_tiles = v_pad // v_tile
    grid = (num_v_tiles, num_row_tiles)   # vocab OUTER -> each weight tile DMA'd once

    temperature = head["temperature"]
    inv_t = 1.0 / temperature

    def prep_rows(a):
        # Temperature folded into the one-time bf16 cast (no per-vocab-tile rescale).
        if temperature != 1.0:
            a = a * inv_t
        a = a.astype(jnp.bfloat16)
        if a.shape[0] != n_pad:
            a = jnp.pad(a, ((0, n_pad - a.shape[0]), (0, 0)))
        return a

    xb = prep_rows(x_flat)
    rxb = prep_rows(ref_flat)
    ids2d = jnp.pad(ids_flat.astype(jnp.int32), (0, n_pad - N)).reshape(1, n_pad)

    has_bias_col = head["bias_col"] is not None
    in_specs = [
        pl.BlockSpec((row_tile, H), lambda k, i: (i, 0)),   # policy activations
        pl.BlockSpec((row_tile, H), lambda k, i: (i, 0)),   # reference activations
        pl.BlockSpec((v_tile, H), lambda k, i: (k, 0)),     # policy weight tile
        pl.BlockSpec((v_tile, H), lambda k, i: (k, 0)),     # reference weight tile
        pl.BlockSpec((1, row_tile), lambda k, i: (0, i)),   # selected token ids
    ]
    inputs = [xb, rxb, head["weight"], head["ref_weight"], ids2d]
    if has_bias_col:
        in_specs += [pl.BlockSpec((v_tile, 1), lambda k, i: (k, 0)),
                     pl.BlockSpec((v_tile, 1), lambda k, i: (k, 0))]
        inputs += [head["bias_col"], head["ref_bias_col"]]

    kernel = functools.partial(_fused_logps_kernel, has_bias_col=has_bias_col)

    flops = 2 * 2 * n_pad * v_pad * H                       # two LM-head matmuls
    bytes_accessed = (2 * v_pad * H * 2                      # both weights, streamed ONCE
                      + 2 * n_pad * H * 2 * num_v_tiles      # activations per vocab tile
                      + 3 * n_pad * 4 * num_v_tiles)         # ids + output writebacks

    out_p, out_r = pl.pallas_call(
        kernel,
        out_shape=(jax.ShapeDtypeStruct((1, n_pad), jnp.float32),
                   jax.ShapeDtypeStruct((1, n_pad), jnp.float32)),
        grid_spec=pltpu.PrefetchScalarGridSpec(
            num_scalar_prefetch=0,
            grid=grid,
            in_specs=in_specs,
            out_specs=[pl.BlockSpec((1, row_tile), lambda k, i: (0, i)),
                       pl.BlockSpec((1, row_tile), lambda k, i: (0, i))],
            scratch_shapes=[pltpu.VMEM((num_row_tiles, row_tile), jnp.float32)] * 6,
        ),
        compiler_params=pltpu.CompilerParams(
            dimension_semantics=("arbitrary", "arbitrary"),
            vmem_limit_bytes=vmem_limit),
        cost_estimate=pl.CostEstimate(
            flops=flops,
            transcendentals=2 * n_pad * v_pad,
            bytes_accessed=bytes_accessed),
    )(*inputs)

    return out_p.reshape(n_pad)[:N], out_r.reshape(n_pad)[:N]


# -----------------------------------------------------------------------------
# GRPO loss epilogue (plain jnp so XLA fuses it with the logps reshape/slice).
# -----------------------------------------------------------------------------
def grpo_loss_from_logps(per_token_logps, ref_per_token_logps, old_per_token_logps,
                         attention_mask, advantages, *, beta=0.1, eps_low=0.2,
                         eps_high=0.2, loss_type="bnpo", max_completion_length=None):
    mask = attention_mask.astype(jnp.float32)
    adv = advantages.astype(jnp.float32)[:, None]
    logp = per_token_logps.astype(jnp.float32)
    old = old_per_token_logps.astype(jnp.float32)

    coef_1 = jnp.exp(logp - old)
    coef_2 = jnp.clip(coef_1, 1.0 - eps_low, 1.0 + eps_high)
    per_token_loss = -jnp.minimum(coef_1 * adv, coef_2 * adv)

    kl_div = None
    if beta != 0.0:
        delta = ref_per_token_logps.astype(jnp.float32) - logp
        kl_div = jnp.exp(delta) - delta - 1.0
        per_token_loss = per_token_loss + beta * kl_div

    mask_sum = jnp.maximum(jnp.sum(mask), 1.0)
    if loss_type == "grpo":
        loss = jnp.mean(jnp.sum(per_token_loss * mask, axis=-1)
                        / jnp.maximum(jnp.sum(mask, axis=-1), 1.0))
    elif loss_type == "bnpo":
        loss = jnp.sum(per_token_loss * mask) / mask_sum
    elif loss_type == "dr_grpo":
        assert max_completion_length is not None
        loss = jnp.sum(per_token_loss * mask) / (per_token_loss.shape[0]
                                                 * max_completion_length)
    else:
        raise ValueError(f"Unknown loss type: {loss_type}")

    metrics = []
    if beta != 0.0:
        metrics.append(jnp.sum(kl_div * mask) / mask_sum)
    is_clipped = ((coef_1 < 1.0 - eps_low) & (adv < 0.0)) | \
                 ((coef_1 > 1.0 + eps_high) & (adv > 0.0))
    metrics.append(jnp.sum(is_clipped.astype(jnp.float32) * mask) / mask_sum)
    return loss, metrics


# -----------------------------------------------------------------------------
# Wrapper reproducing TorchLMHeadGRPO.forward (use_ref_model=True path).
# -----------------------------------------------------------------------------
def lm_head_grpo_forward(x, selected_token_ids, attention_mask, advantages, ref_input,
                         head, *, beta=0.1, eps_low=0.2, eps_high=0.2,
                         loss_type="bnpo", max_completion_length=None,
                         ref_per_token_logps=None, old_per_token_logps=None):
    # TODO(synk): forward-only; training through this needs a custom_vjp backward
    #             kernel for fused_per_token_logps.
    # TODO(synk): use_ref_model=False path (skip the reference matmul) is not wired up.
    B, T, H = x.shape
    N = B * T

    logp_flat, ref_logp_flat = fused_per_token_logps(
        x.reshape(N, H), ref_input.reshape(N, H), selected_token_ids.reshape(N), head)
    per_logps = logp_flat.reshape(B, T)

    if ref_per_token_logps is None:
        ref_logps = lax.stop_gradient(ref_logp_flat.reshape(B, T))  # torch.no_grad()
    else:
        ref_logps = ref_per_token_logps.astype(jnp.float32)
    old_logps = (lax.stop_gradient(per_logps) if old_per_token_logps is None
                 else old_per_token_logps.astype(jnp.float32))       # .detach()

    return grpo_loss_from_logps(per_logps, ref_logps, old_logps,
                                attention_mask, advantages,
                                beta=beta, eps_low=eps_low, eps_high=eps_high,
                                loss_type=loss_type,
                                max_completion_length=max_completion_length)


# -----------------------------------------------------------------------------
# Pure-JAX reference (correctness check). matmul_dtype=bfloat16 emulates the
# kernel's MXU precision; float32 is the exact PyTorch-equivalent path.
# -----------------------------------------------------------------------------
def reference_forward(x, ids, mask, adv, ref_x, W, Wr, bW=None, bWr=None, *,
                      beta=0.1, eps_low=0.2, eps_high=0.2, temperature=1.0,
                      loss_type="bnpo", max_completion_length=None,
                      matmul_dtype=jnp.float32):
    def per_token_logps(inp, w, b):
        if matmul_dtype == jnp.bfloat16:
            logits = jnp.einsum("bth,vh->btv", (inp / temperature).astype(jnp.bfloat16),
                                w.astype(jnp.bfloat16),
                                preferred_element_type=jnp.float32)
            if b is not None:
                logits = logits + b.astype(jnp.float32) / temperature
        else:
            logits = jnp.einsum("bth,vh->btv", inp.astype(jnp.float32),
                                w.astype(jnp.float32))
            if b is not None:
                logits = logits + b.astype(jnp.float32)
            logits = logits / temperature
        lp = jax.nn.log_softmax(logits.astype(jnp.float32), axis=-1)
        return jnp.take_along_axis(lp, ids[..., None], axis=-1)[..., 0]

    logp = per_token_logps(x, W, bW)
    ref_lp = per_token_logps(ref_x, Wr, bWr)
    return grpo_loss_from_logps(logp, ref_lp, logp, mask, adv, beta=beta,
                                eps_low=eps_low, eps_high=eps_high,
                                loss_type=loss_type,
                                max_completion_length=max_completion_length)


if __name__ == "__main__":
    def run_case(name, B, T, H, V, *, bias, temperature, loss_type, seed):
        key = jax.random.PRNGKey(seed)
        kx, kref, kw, kwr, kb, kbr, kid, kadv, kmask = jax.random.split(key, 9)
        x = jax.random.normal(kx, (B, T, H), dtype=jnp.float32)
        # reference model close to the policy (realistic GRPO setup; keeps KL small)
        ref_input = x + 0.05 * jax.random.normal(kref, (B, T, H), dtype=jnp.float32)
        wscale = (1.0 / H) ** 0.5
        lin_weight = jax.random.normal(kw, (V, H), dtype=jnp.float32) * wscale
        ref_lin_weight = lin_weight + 0.05 * jax.random.normal(
            kwr, (V, H), dtype=jnp.float32) * wscale
        lin_bias = (0.1 * jax.random.normal(kb, (V,), dtype=jnp.float32)) if bias else None
        ref_lin_bias = ((lin_bias + 0.05 * jax.random.normal(kbr, (V,), dtype=jnp.float32))
                        if bias else None)
        selected_token_ids = jax.random.randint(kid, (B, T), 0, V, dtype=jnp.int32)
        attention_mask = (jax.random.uniform(kmask, (B, T)) > 0.2).astype(jnp.float32)
        advantages = jax.random.normal(kadv, (B,), dtype=jnp.float32)

        head = prepare_grpo_lm_head(lin_weight, ref_lin_weight, lin_bias, ref_lin_bias,
                                    temperature=temperature)
        loss, metrics = lm_head_grpo_forward(
            x, selected_token_ids, attention_mask, advantages, ref_input, head,
            beta=0.1, eps_low=0.2, eps_high=0.2, loss_type=loss_type)
        jax.block_until_ready(loss)
        for m in metrics:
            jax.block_until_ready(m)

        # Tight check vs a reference matching the kernel's bf16-MXU precision.
        loss_bf, metrics_bf = reference_forward(
            x, selected_token_ids, attention_mask, advantages, ref_input,
            lin_weight, ref_lin_weight, lin_bias, ref_lin_bias,
            beta=0.1, eps_low=0.2, eps_high=0.2, temperature=temperature,
            loss_type=loss_type, matmul_dtype=jnp.bfloat16)
        assert jnp.allclose(loss, loss_bf, rtol=2e-3, atol=2e-3), (name, loss, loss_bf)
        for m, mr in zip(metrics, metrics_bf):
            assert jnp.allclose(m, mr, rtol=2e-3, atol=2e-3), (name, m, mr)

        # Loose sanity check vs the exact float32 PyTorch-equivalent path.
        loss_f32, metrics_f32 = reference_forward(
            x, selected_token_ids, attention_mask, advantages, ref_input,
            lin_weight, ref_lin_weight, lin_bias, ref_lin_bias,
            beta=0.1, eps_low=0.2, eps_high=0.2, temperature=temperature,
            loss_type=loss_type, matmul_dtype=jnp.float32)
        assert jnp.allclose(loss, loss_f32, rtol=1e-1, atol=1e-1), (name, loss, loss_f32)
        for m, mr in zip(metrics, metrics_f32):
            assert jnp.allclose(m, mr, rtol=1e-1, atol=1e-1), (name, m, mr)

    # 1) module defaults: bias=False, temperature=1.0, loss_type='bnpo'
    run_case("defaults", B=2, T=8, H=32, V=128,
             bias=False, temperature=1.0, loss_type="bnpo", seed=0)
    # 2) exercise vocab padding (V not a multiple of 128), bias, temperature, 'grpo'
    run_case("padded+bias", B=2, T=8, H=32, V=100,
             bias=True, temperature=2.0, loss_type="grpo", seed=1)

    print("KERNEL_OK")
</pallas_src>

<mosaic_0001>
module attributes {stable_mosaic.version = 11 : i64} {
  func.func @_fused_logps_kernel(%arg0: i32, %arg1: i32, %arg2: memref<128x32xbf16, #tpu.memory_space<vmem>>, %arg3: memref<128x32xbf16, #tpu.memory_space<vmem>>, %arg4: memref<128x32xbf16, #tpu.memory_space<vmem>>, %arg5: memref<128x32xbf16, #tpu.memory_space<vmem>>, %arg6: memref<1x128xi32, #tpu.memory_space<vmem>>, %arg7: memref<1x128xf32, #tpu.memory_space<vmem>>, %arg8: memref<1x128xf32, #tpu.memory_space<vmem>>, %arg9: memref<1x128xf32, #tpu.memory_space<vmem>>, %arg10: memref<1x128xf32, #tpu.memory_space<vmem>>, %arg11: memref<1x128xf32, #tpu.memory_space<vmem>>, %arg12: memref<1x128xf32, #tpu.memory_space<vmem>>, %arg13: memref<1x128xf32, #tpu.memory_space<vmem>>, %arg14: memref<1x128xf32, #tpu.memory_space<vmem>>) attributes {dimension_semantics = [#tpu.dimension_semantics<arbitrary>, #tpu.dimension_semantics<arbitrary>], iteration_bounds = array<i64: 1, 1>, scalar_prefetch = 0 : i64, scratch_operands = 6 : i64, tpu.core_type = #tpu.core_type<tc>, window_params = [{transform_indices = @transform_0, window_bounds = array<i64: 128, 32>}, {transform_indices = @transform_1, window_bounds = array<i64: 128, 32>}, {transform_indices = @transform_2, window_bounds = array<i64: 128, 32>}, {transform_indices = @transform_3, window_bounds = array<i64: 128, 32>}, {transform_indices = @transform_4, window_bounds = array<i64: 1, 128>}, {transform_indices = @transform_5, window_bounds = array<i64: 1, 128>}, {transform_indices = @transform_6, window_bounds = array<i64: 1, 128>}]} {
    %c0_i32 = arith.constant 0 : i32
    %0 = arith.cmpi eq, %arg0, %c0_i32 : i32
    %1 = arith.extui %0 : i1 to i32
    %c0_i32_0 = arith.constant 0 : i32
    %2 = arith.cmpi ne, %1, %c0_i32_0 : i32
    scf.if %2 {
      %cst_33 = arith.constant -1.000000e+30 : f32
      %77 = vector.broadcast %cst_33 : f32 to vector<1x128xf32>
      %cst_34 = arith.constant 0.000000e+00 : f32
      %78 = vector.broadcast %cst_34 : f32 to vector<1x128xf32>
      %79 = arith.index_cast %arg1 : i32 to index
      %c0_35 = arith.constant 0 : index
      %80 = vector.load %arg9[%79, %c0_35] : memref<1x128xf32, #tpu.memory_space<vmem>>, vector<1x128xf32>
      tpu.vector_store %arg9[%79, %c0_35], %77 {strides = array<i32>} : memref<1x128xf32, #tpu.memory_space<vmem>>, vector<1x128xf32>,
      %81 = arith.index_cast %arg1 : i32 to index
      %c0_36 = arith.constant 0 : index
      %82 = vector.load %arg12[%81, %c0_36] : memref<1x128xf32, #tpu.memory_space<vmem>>, vector<1x128xf32>
      tpu.vector_store %arg12[%81, %c0_36], %77 {strides = array<i32>} : memref<1x128xf32, #tpu.memory_space<vmem>>, vector<1x128xf32>,
      %83 = arith.index_cast %arg1 : i32 to index
      %c0_37 = arith.constant 0 : index
      %84 = vector.load %arg10[%83, %c0_37] : memref<1x128xf32, #tpu.memory_space<vmem>>, vector<1x128xf32>
      tpu.vector_store %arg10[%83, %c0_37], %78 {strides = array<i32>} : memref<1x128xf32, #tpu.memory_space<vmem>>, vector<1x128xf32>,
      %85 = arith.index_cast %arg1 : i32 to index
      %c0_38 = arith.constant 0 : index
      %86 = vector.load %arg13[%85, %c0_38] : memref<1x128xf32, #tpu.memory_space<vmem>>, vector<1x128xf32>
      tpu.vector_store %arg13[%85, %c0_38], %78 {strides = array<i32>} : memref<1x128xf32, #tpu.memory_space<vmem>>, vector<1x128xf32>,
      %87 = arith.index_cast %arg1 : i32 to index
      %c0_39 = arith.constant 0 : index
      %88 = vector.load %arg11[%87, %c0_39] : memref<1x128xf32, #tpu.memory_space<vmem>>, vector<1x128xf32>
      tpu.vector_store %arg11[%87, %c0_39], %78 {strides = array<i32>} : memref<1x128xf32, #tpu.memory_space<vmem>>, vector<1x128xf32>,
      %89 = arith.index_cast %arg1 : i32 to index
      %c0_40 = arith.constant 0 : index
      %90 = vector.load %arg14[%89, %c0_40] : memref<1x128xf32, #tpu.memory_space<vmem>>, vector<1x128xf32>
      tpu.vector_store %arg14[%89, %c0_40], %78 {strides = array<i32>} : memref<1x128xf32, #tpu.memory_space<vmem>>, vector<1x128xf32>,
    } else {
    }
    %c0 = arith.constant 0 : index
    %c0_1 = arith.constant 0 : index
    %3 = vector.load %arg6[%c0, %c0_1] : memref<1x128xi32, #tpu.memory_space<vmem>>, vector<1x128xi32>
    %4 = tpu.iota {dimensions = array<i32: 0>} : vector<128x128xi32>
    %c128_i32 = arith.constant 128 : i32
    %5 = arith.muli %arg0, %c128_i32 : i32
    %6 = vector.broadcast %5 : i32 to vector<128x128xi32>
    %7 = arith.addi %4, %6 : vector<128x128xi32>
    %8 = vector.broadcast %3 : vector<1x128xi32> to vector<128x128xi32>
    %9 = arith.cmpi eq, %7, %8 : vector<128x128xi32>
    %c0_2 = arith.constant 0 : index
    %c0_3 = arith.constant 0 : index
    %10 = vector.load %arg4[%c0_2, %c0_3] : memref<128x32xbf16, #tpu.memory_space<vmem>>, vector<128x32xbf16>
    %c0_4 = arith.constant 0 : index
    %c0_5 = arith.constant 0 : index
    %11 = vector.load %arg2[%c0_4, %c0_5] : memref<128x32xbf16, #tpu.memory_space<vmem>>, vector<128x32xbf16>
    %cst = arith.constant dense<0.000000e+00> : vector<128x128xf32>
    %12 = tpu.matmul %10, %11, %cst {dimension_numbers = #tpu.dot_dimension_numbers<[1], [1], [0], [0], [0, 0, 1, 0], [], []>} : vector<128x32xbf16>, vector<128x32xbf16>, vector<128x128xf32> -> vector<128x128xf32>
    %cst_6 = arith.constant dense<0xFF800000> : vector<128xf32>
    %13 = vector.multi_reduction <maximumf>, %12, %cst_6 [0] : vector<128x128xf32> to vector<128xf32>
    %14 = vector.shape_cast %13 : vector<128xf32> to vector<1x128xf32>
    %15 = arith.index_cast %arg1 : i32 to index
    %c0_7 = arith.constant 0 : index
    %16 = vector.load %arg9[%15, %c0_7] : memref<1x128xf32, #tpu.memory_space<vmem>>, vector<1x128xf32>
    %17 = arith.maximumf %16, %14 : vector<1x128xf32>
    %18 = arith.subf %16, %17 : vector<1x128xf32>
    %19 = math.exp %18 : vector<1x128xf32>
    %20 = arith.index_cast %arg1 : i32 to index
    %c0_8 = arith.constant 0 : index
    %21 = vector.load %arg10[%20, %c0_8] : memref<1x128xf32, #tpu.memory_space<vmem>>, vector<1x128xf32>
    %22 = arith.mulf %19, %21 : vector<1x128xf32>
    %23 = vector.broadcast %17 : vector<1x128xf32> to vector<128x128xf32>
    %24 = arith.subf %12, %23 : vector<128x128xf32>
    %25 = math.exp %24 : vector<128x128xf32>
    %cst_9 = arith.constant dense<0.000000e+00> : vector<128xf32>
    %26 = vector.multi_reduction <add>, %25, %cst_9 [0] : vector<128x128xf32> to vector<128xf32>
    %27 = vector.shape_cast %26 : vector<128xf32> to vector<1x128xf32>
    %28 = arith.addf %22, %27 : vector<1x128xf32>
    %29 = arith.index_cast %arg1 : i32 to index
    %c0_10 = arith.constant 0 : index
    %30 = vector.load %arg10[%29, %c0_10] : memref<1x128xf32, #tpu.memory_space<vmem>>, vector<1x128xf32>
    tpu.vector_store %arg10[%29, %c0_10], %28 {strides = array<i32>} : memref<1x128xf32, #tpu.memory_space<vmem>>, vector<1x128xf32>,
    %31 = arith.index_cast %arg1 : i32 to index
    %c0_11 = arith.constant 0 : index
    %32 = vector.load %arg11[%31, %c0_11] : memref<1x128xf32, #tpu.memory_space<vmem>>, vector<1x128xf32>
    %cst_12 = arith.constant 0.000000e+00 : f32
    %33 = vector.broadcast %cst_12 : f32 to vector<128x128xf32>
    %34 = arith.select %9, %12, %33 : vector<128x128xi1>, vector<128x128xf32>
    %cst_13 = arith.constant dense<0.000000e+00> : vector<128xf32>
    %35 = vector.multi_reduction <add>, %34, %cst_13 [0] : vector<128x128xf32> to vector<128xf32>
    %36 = vector.shape_cast %35 : vector<128xf32> to vector<1x128xf32>
    %37 = arith.addf %32, %36 : vector<1x128xf32>
    %38 = arith.index_cast %arg1 : i32 to index
    %c0_14 = arith.constant 0 : index
    %39 = vector.load %arg11[%38, %c0_14] : memref<1x128xf32, #tpu.memory_space<vmem>>, vector<1x128xf32>
    tpu.vector_store %arg11[%38, %c0_14], %37 {strides = array<i32>} : memref<1x128xf32, #tpu.memory_space<vmem>>, vector<1x128xf32>,
    %40 = arith.index_cast %arg1 : i32 to index
    %c0_15 = arith.constant 0 : index
    %41 = vector.load %arg9[%40, %c0_15] : memref<1x128xf32, #tpu.memory_space<vmem>>, vector<1x128xf32>
    tpu.vector_store %arg9[%40, %c0_15], %17 {strides = array<i32>} : memref<1x128xf32, #tpu.memory_space<vmem>>, vector<1x128xf32>,
    %c0_16 = arith.constant 0 : index
    %c0_17 = arith.constant 0 : index
    %42 = vector.load %arg5[%c0_16, %c0_17] : memref<128x32xbf16, #tpu.memory_space<vmem>>, vector<128x32xbf16>
    %c0_18 = arith.constant 0 : index
    %c0_19 = arith.constant 0 : index
    %43 = vector.load %arg3[%c0_18, %c0_19] : memref<128x32xbf16, #tpu.memory_space<vmem>>, vector<128x32xbf16>
    %cst_20 = arith.constant dense<0.000000e+00> : vector<128x128xf32>
    %44 = tpu.matmul %42, %43, %cst_20 {dimension_numbers = #tpu.dot_dimension_numbers<[1], [1], [0], [0], [0, 0, 1, 0], [], []>} : vector<128x32xbf16>, vector<128x32xbf16>, vector<128x128xf32> -> vector<128x128xf32>
    %cst_21 = arith.constant dense<0xFF800000> : vector<128xf32>
    %45 = vector.multi_reduction <maximumf>, %44, %cst_21 [0] : vector<128x128xf32> to vector<128xf32>
    %46 = vector.shape_cast %45 : vector<128xf32> to vector<1x128xf32>
    %47 = arith.index_cast %arg1 : i32 to index
    %c0_22 = arith.constant 0 : index
    %48 = vector.load %arg12[%47, %c0_22] : memref<1x128xf32, #tpu.memory_space<vmem>>, vector<1x128xf32>
    %49 = arith.maximumf %48, %46 : vector<1x128xf32>
    %50 = arith.subf %48, %49 : vector<1x128xf32>
    %51 = math.exp %50 : vector<1x128xf32>
    %52 = arith.index_cast %arg1 : i32 to index
    %c0_23 = arith.constant 0 : index
    %53 = vector.load %arg13[%52, %c0_23] : memref<1x128xf32, #tpu.memory_space<vmem>>, vector<1x128xf32>
    %54 = arith.mulf %51, %53 : vector<1x128xf32>
    %55 = vector.broadcast %49 : vector<1x128xf32> to vector<128x128xf32>
    %56 = arith.subf %44, %55 : vector<128x128xf32>
    %57 = math.exp %56 : vector<128x128xf32>
    %cst_24 = arith.constant dense<0.000000e+00> : vector<128xf32>
    %58 = vector.multi_reduction <add>, %57, %cst_24 [0] : vector<128x128xf32> to vector<128xf32>
    %59 = vector.shape_cast %58 : vector<128xf32> to vector<1x128xf32>
    %60 = arith.addf %54, %59 : vector<1x128xf32>
    %61 = arith.index_cast %arg1 : i32 to index
    %c0_25 = arith.constant 0 : index
    %62 = vector.load %arg13[%61, %c0_25] : memref<1x128xf32, #tpu.memory_space<vmem>>, vector<1x128xf32>
    tpu.vector_store %arg13[%61, %c0_25], %60 {strides = array<i32>} : memref<1x128xf32, #tpu.memory_space<vmem>>, vector<1x128xf32>,
    %63 = arith.index_cast %arg1 : i32 to index
    %c0_26 = arith.constant 0 : index
    %64 = vector.load %arg14[%63, %c0_26] : memref<1x128xf32, #tpu.memory_space<vmem>>, vector<1x128xf32>
    %cst_27 = arith.constant 0.000000e+00 : f32
    %65 = vector.broadcast %cst_27 : f32 to vector<128x128xf32>
    %66 = arith.select %9, %44, %65 : vector<128x128xi1>, vector<128x128xf32>
    %cst_28 = arith.constant dense<0.000000e+00> : vector<128xf32>
    %67 = vector.multi_reduction <add>, %66, %cst_28 [0] : vector<128x128xf32> to vector<128xf32>
    %68 = vector.shape_cast %67 : vector<128xf32> to vector<1x128xf32>
    %69 = arith.addf %64, %68 : vector<1x128xf32>
    %70 = arith.index_cast %arg1 : i32 to index
    %c0_29 = arith.constant 0 : index
    %71 = vector.load %arg14[%70, %c0_29] : memref<1x128xf32, #tpu.memory_space<vmem>>, vector<1x128xf32>
    tpu.vector_store %arg14[%70, %c0_29], %69 {strides = array<i32>} : memref<1x128xf32, #tpu.memory_space<vmem>>, vector<1x128xf32>,
    %72 = arith.index_cast %arg1 : i32 to index
    %c0_30 = arith.constant 0 : index
    %73 = vector.load %arg12[%72, %c0_30] : memref<1x128xf32, #tpu.memory_space<vmem>>, vector<1x128xf32>
    tpu.vector_store %arg12[%72, %c0_30], %49 {strides = array<i32>} : memref<1x128xf32, #tpu.memory_space<vmem>>, vector<1x128xf32>,
    %c0_i32_31 = arith.constant 0 : i32
    %74 = arith.cmpi eq, %arg0, %c0_i32_31 : i32
    %75 = arith.extui %74 : i1 to i32
    %c0_i32_32 = arith.constant 0 : i32
    %76 = arith.cmpi ne, %75, %c0_i32_32 : i32
    scf.if %76 {
      %77 = arith.index_cast %arg1 : i32 to index
      %c0_33 = arith.constant 0 : index
      %78 = vector.load %arg11[%77, %c0_33] : memref<1x128xf32, #tpu.memory_space<vmem>>, vector<1x128xf32>
      %79 = arith.index_cast %arg1 : i32 to index
      %c0_34 = arith.constant 0 : index
      %80 = vector.load %arg9[%79, %c0_34] : memref<1x128xf32, #tpu.memory_space<vmem>>, vector<1x128xf32>
      %81 = arith.index_cast %arg1 : i32 to index
      %c0_35 = arith.constant 0 : index
      %82 = vector.load %arg10[%81, %c0_35] : memref<1x128xf32, #tpu.memory_space<vmem>>, vector<1x128xf32>
      %83 = math.log %82 : vector<1x128xf32>
      %84 = arith.addf %80, %83 : vector<1x128xf32>
      %85 = arith.subf %78, %84 : vector<1x128xf32>
      %c0_36 = arith.constant 0 : index
      %c0_37 = arith.constant 0 : index
      %86 = vector.load %arg7[%c0_36, %c0_37] : memref<1x128xf32, #tpu.memory_space<vmem>>, vector<1x128xf32>
      tpu.vector_store %arg7[%c0_36, %c0_37], %85 {strides = array<i32>} : memref<1x128xf32, #tpu.memory_space<vmem>>, vector<1x128xf32>,
      %87 = arith.index_cast %arg1 : i32 to index
      %c0_38 = arith.constant 0 : index
      %88 = vector.load %arg14[%87, %c0_38] : memref<1x128xf32, #tpu.memory_space<vmem>>, vector<1x128xf32>
      %89 = arith.index_cast %arg1 : i32 to index
      %c0_39 = arith.constant 0 : index
      %90 = vector.load %arg12[%89, %c0_39] : memref<1x128xf32, #tpu.memory_space<vmem>>, vector<1x128xf32>
      %91 = arith.index_cast %arg1 : i32 to index
      %c0_40 = arith.constant 0 : index
      %92 = vector.load %arg13[%91, %c0_40] : memref<1x128xf32, #tpu.memory_space<vmem>>, vector<1x128xf32>
      %93 = math.log %92 : vector<1x128xf32>
      %94 = arith.addf %90, %93 : vector<1x128xf32>
      %95 = arith.subf %88, %94 : vector<1x128xf32>
      %c0_41 = arith.constant 0 : index
      %c0_42 = arith.constant 0 : index
      %96 = vector.load %arg8[%c0_41, %c0_42] : memref<1x128xf32, #tpu.memory_space<vmem>>, vector<1x128xf32>
      tpu.vector_store %arg8[%c0_41, %c0_42], %95 {strides = array<i32>} : memref<1x128xf32, #tpu.memory_space<vmem>>, vector<1x128xf32>,
    } else {
    }
    return
  }
  func.func @transform_0(%arg0: i32, %arg1: i32) -> (i32, i32) {
    %c0_i32 = arith.constant 0 : i32
    %c0_i32_0 = arith.constant 0 : i32
    return %arg1, %c0_i32 : i32, i32
  }
  func.func @transform_1(%arg0: i32, %arg1: i32) -> (i32, i32) {
    %c0_i32 = arith.constant 0 : i32
    %c0_i32_0 = arith.constant 0 : i32
    return %arg1, %c0_i32 : i32, i32
  }
  func.func @transform_2(%arg0: i32, %arg1: i32) -> (i32, i32) {
    %c0_i32 = arith.constant 0 : i32
    %c0_i32_0 = arith.constant 0 : i32
    return %arg0, %c0_i32 : i32, i32
  }
  func.func @transform_3(%arg0: i32, %arg1: i32) -> (i32, i32) {
    %c0_i32 = arith.constant 0 : i32
    %c0_i32_0 = arith.constant 0 : i32
    return %arg0, %c0_i32 : i32, i32
  }
  func.func @transform_4(%arg0: i32, %arg1: i32) -> (i32, i32) {
    %c0_i32 = arith.constant 0 : i32
    %c0_i32_0 = arith.constant 0 : i32
    return %c0_i32, %arg1 : i32, i32
  }
  func.func @transform_5(%arg0: i32, %arg1: i32) -> (i32, i32) {
    %c0_i32 = arith.constant 0 : i32
    %c0_i32_0 = arith.constant 0 : i32
    return %c0_i32, %arg1 : i32, i32
  }
  func.func @transform_6(%arg0: i32, %arg1: i32) -> (i32, i32) {
    %c0_i32 = arith.constant 0 : i32
    %c0_i32_0 = arith.constant 0 : i32
    return %c0_i32, %arg1 : i32, i32
  }
}

</mosaic_0001>

<bundles_post_ra>
// kernel: tpu_custom_call.1
= control target key start
LH: loop header
LB: loop body
LE: loop exit
PB: predicated region body
PF: predicated region fallthrough
CT: control target
= control target key end

     0   :  { %12 = vsyncpa [#allocation9], 0  ;;  %vm203_vm0 = vcmask 261120   ;;  %s1783_s0 = inlined_call_operand.vmem [shape: bf16[128,32], index: 0, kind: input, shape index: {}]   ;;  %s1784_s1 = inlined_call_operand.vmem [shape: bf16[128,32], index: 1, kind: input, shape index: {}]   ;;  %s1785_s2 = inlined_call_operand.vmem [shape: bf16[128,32], index: 2, kind: input, shape index: {}]   ;;  %s1786_s3 = inlined_call_operand.vmem [shape: bf16[128,32], index: 3, kind: input, shape index: {}]   ;;  %s1787_s4 = inlined_call_operand.vmem [shape: s32[1,128], index: 4, kind: input, shape index: {}]   ;;  %s1788_s5 = inlined_call_operand.hbm [shape: f32[1,128], index: 5, kind: output, shape index: {0}]   ;;  %s1789_s6 = inlined_call_operand.hbm [shape: f32[1,128], index: 6, kind: output, shape index: {1}]  }
   0x1   :  { %v1110_v0 = vld [vmem:[%s1783_s0 + $0x38] sm:$0xff]   ;;  %v1112_v3 = vld [vmem:[%s1783_s0 + $0x30] sm:$0xff]   ;;  %v1114_v7 = vld [vmem:[%s1783_s0 + $0x28] sm:$0xff]  }
   0x2   :  { %v1111_v1 = vld [vmem:[%s1784_s1 + $0x38] sm:$0xff]   ;;  %1090 = vmatprep.subr.msk.bf16.mxu0 %vm203_vm0, %v1110_v0  ;;  %v250_v2 = vsel %vm203_vm0, %v1110_v0, 0  ;;  %v1113_v5 = vld [vmem:[%s1784_s1 + $0x30] sm:$0xff]   ;;  %v247_v6 = vsel %vm203_vm0, %v1112_v3, 0  ;;  %v1115_v9 = vld [vmem:[%s1784_s1 + $0x28] sm:$0xff]   ;;  %v244_v12 = vsel %vm203_vm0, %v1114_v7, 0 }
   0x3   :  { %1098 = vmatprep.subr.msk.bf16.mxu1 %vm203_vm0, %v1111_v1  ;;  %1027 = vmatpush3.bf16.xpose.msra.mxu0 %v250_v2  ;;  %v653_v4 = vsel %vm203_vm0, %v1111_v1, 0  ;;  %v650_v8 = vsel %vm203_vm0, %v1113_v5, 0  ;;  %v1116_v10 = vld [vmem:[%s1783_s0 + $0x20] sm:$0xff]   ;;  %v647_v14 = vsel %vm203_vm0, %v1115_v9, 0  ;;  %v1118_v17 = vld [vmem:[%s1783_s0 + $0x18] sm:$0xff]   ;;  %v1120_v21 = vld [vmem:[%s1783_s0 + $0x10] sm:$0xff]  }
   0x4   :  { %1059 = vmatpush3.bf16.xpose.msra.mxu1 %v653_v4  ;;  %1091 = vmatprep.subr.msk.bf16.mxu0 %vm203_vm0, %v1112_v3  ;;  %v1117_v11 = vld [vmem:[%s1784_s1 + $0x20] sm:$0xff]   ;;  %v241_v16 = vsel %vm203_vm0, %v1116_v10, 0  ;;  %v1119_v19 = vld [vmem:[%s1784_s1 + $0x18] sm:$0xff]   ;;  %v238_v20 = vsel %vm203_vm0, %v1118_v17, 0 }
   0x5   :  { %1099 = vmatprep.subr.msk.bf16.mxu1 %vm203_vm0, %v1113_v5  ;;  %v1126_v13 = vld [vmem:[%s1785_s2] sm:$0xff]   ;;  %v644_v18 = vsel %vm203_vm0, %v1117_v11, 0 }
   0x6   :  { %v1127_v15 = vld [vmem:[%s1786_s3] sm:$0xff]   ;;  %1042 = vmatprep.mubr.msk.bf16.mxu0 %vm203_vm0, %v1126_v13 }
   0x7   :  { %1074 = vmatprep.mubr.msk.bf16.mxu1 %vm203_vm0, %v1127_v15 }
   0xb   :  { %1029 = vmatpush3.bf16.xpose.msra.mxu0 %v247_v6 }
   0xc   :  { %1061 = vmatpush3.bf16.xpose.msra.mxu1 %v650_v8  ;;  %1092 = vmatprep.subr.msk.bf16.mxu0 %vm203_vm0, %v1114_v7 }
   0xd   :  { %1100 = vmatprep.subr.msk.bf16.mxu1 %vm203_vm0, %v1115_v9 }
  0x13   :  { %1031 = vmatpush3.bf16.xpose.msra.mxu0 %v244_v12 }
  0x14   :  { %1063 = vmatpush3.bf16.xpose.msra.mxu1 %v647_v14  ;;  %1093 = vmatprep.subr.msk.bf16.mxu0 %vm203_vm0, %v1116_v10 }
  0x15   :  { %1101 = vmatprep.subr.msk.bf16.mxu1 %vm203_vm0, %v1117_v11 }
  0x1b   :  { %1033 = vmatpush3.bf16.xpose.msra.mxu0 %v241_v16 }
  0x1c   :  { %1065 = vmatpush3.bf16.xpose.msra.mxu1 %v644_v18  ;;  %1094 = vmatprep.subr.msk.bf16.mxu0 %vm203_vm0, %v1118_v17 }
  0x1d   :  { %1102 = vmatprep.subr.msk.bf16.mxu1 %vm203_vm0, %v1119_v19 }
  0x1e   :  { %13 = vsyncpa [#allocation11], 0  ;;  %v641_v22 = vsel %vm203_vm0, %v1119_v19, 0  ;;  %v1121_v23 = vld [vmem:[%s1784_s1 + $0x10] sm:$0xff]   ;;  %v235_v24 = vsel %vm203_vm0, %v1120_v21, 0  ;;  %v1122_v25 = vld [vmem:[%s1783_s0 + $0x8] sm:$0xff]   ;;  %v36_v50 = vlaneseq }
  0x1f   :  { %v638_v26 = vsel %vm203_vm0, %v1121_v23, 0  ;;  %v1123_v27 = vld [vmem:[%s1784_s1 + $0x8] sm:$0xff]   ;;  %v232_v28 = vsel %vm203_vm0, %v1122_v25, 0  ;;  %v1124_v29 = vld [vmem:[%s1783_s0] sm:$0xff]   ;;  %v1130_v36 = vld [vmem:[%s1785_s2 + $0x10] sm:$0xff]   ;;  %v1259_v49 = vmov 0.0  }
  0x20   :  { %v635_v30 = vsel %vm203_vm0, %v1123_v27, 0  ;;  %v1125_v31 = vld [vmem:[%s1784_s1] sm:$0xff]   ;;  %v229_v32 = vsel %vm203_vm0, %v1124_v29, 0  ;;  %v1128_v34 = vld [vmem:[%s1785_s2 + $0x8] sm:$0xff]   ;;  %v1131_v37 = vld [vmem:[%s1786_s3 + $0x10] sm:$0xff]   ;;  %v1441_v51 = vshrl.u32 %v36_v50, 7 }
  0x21   :  { %v632_v33 = vsel %vm203_vm0, %v1125_v31, 0  ;;  %v1129_v35 = vld [vmem:[%s1786_s3 + $0x8] sm:$0xff]   ;;  %v1132_v38 = vld [vmem:[%s1785_s2 + $0x18] sm:$0xff]   ;;  %v1134_v40 = vld [vmem:[%s1785_s2 + $0x20] sm:$0xff]   ;;  %v1258_v48 = vmov -1e+30  }
  0x22   :  { %v1133_v39 = vld [vmem:[%s1786_s3 + $0x18] sm:$0xff]   ;;  %v1135_v41 = vld [vmem:[%s1786_s3 + $0x20] sm:$0xff]   ;;  %v1136_v42 = vld [vmem:[%s1785_s2 + $0x28] sm:$0xff]   ;;  %29 = vst [vmem:[#allocation2] sm:$0x1] %v1258_v48  ;;  %v38_v53 = vadd.s32 8, %v1441_v51 }
  0x23   :  { %1035 = vmatpush3.bf16.xpose.msra.mxu0 %v238_v20  ;;  %v1137_v43 = vld [vmem:[%s1786_s3 + $0x28] sm:$0xff]   ;;  %v1138_v44 = vld [vmem:[%s1785_s2 + $0x30] sm:$0xff]   ;;  %v1140_v46 = vld [vmem:[%s1785_s2 + $0x38] sm:$0xff]   ;;  %31 = vst [vmem:[#allocation3] sm:$0x1] %v1259_v49  ;;  %v39_v55 = vadd.s32 16, %v1441_v51 }
  0x24   :  { %1067 = vmatpush3.bf16.xpose.msra.mxu1 %v641_v22  ;;  %1095 = vmatprep.subr.msk.bf16.mxu0 %vm203_vm0, %v1120_v21  ;;  %v1139_v45 = vld [vmem:[%s1786_s3 + $0x30] sm:$0xff]   ;;  %v1141_v47 = vld [vmem:[%s1786_s3 + $0x38] sm:$0xff]   ;;  %32 = vst [vmem:[#allocation6] sm:$0x1] %v1259_v49  ;;  %33 = vst [vmem:[#allocation4] sm:$0x1] %v1259_v49 }
  0x25   :  { %1103 = vmatprep.subr.msk.bf16.mxu1 %vm203_vm0, %v1121_v23  ;;  %30 = vst [vmem:[#allocation5] sm:$0x1] %v1258_v48  ;;  %34 = vst [vmem:[#allocation7] sm:$0x1] %v1259_v49  ;;  %v1454_v57 = vld [vmem:[%s1787_s4] ss:$0 sm:$0xff] }
  0x26   :  { %v40_v59 = vadd.s32 24, %v1441_v51  ;;  %vm75_vm1 = vcmp.eq.s32.totalorder %v1441_v51, %v1454_v57  ;;  %vm76_vm2 = vcmp.eq.s32.totalorder %v38_v53, %v1454_v57  ;;  %vm77_vm3 = vcmp.eq.s32.totalorder %v39_v55, %v1454_v57  ;;  %s1260_s4 = smov [#allocation8]  }
  0x27   :  { %v41_v63 = vadd.s32 32, %v1441_v51  ;;  %v42_v7 = vadd.s32 40, %v1441_v51  ;;  %v43_v13 = vadd.s32 48, %v1441_v51  ;;  %v44_v20 = vadd.s32 56, %v1441_v51  ;;  %s923_s10 = sshll.u32 %s1260_s4, 4  ;;  %s924_s10 = int_to_ptr.vmem [resolvable:$true] %s923_s10 }
  0x28   :  { %vm78_vm4 = vcmp.eq.s32.totalorder %v40_v59, %v1454_v57  ;;  %v1568_v59 = vadd.s32 120, %v1441_v51  ;;  %s1214_s11 = scalar_lea.vmem %s924_s10, 16  ;;  %s1218_s1 = scalar_lea.vmem %s924_s10, 32 }
  0x29   :  { %vm79_vm5 = vcmp.eq.s32.totalorder %v41_v63, %v1454_v57  ;;  %vm80_vm6 = vcmp.eq.s32.totalorder %v42_v7, %v1454_v57  ;;  %vm81_vm7 = vcmp.eq.s32.totalorder %v43_v13, %v1454_v57  ;;  %vm82_vm8 = vcmp.eq.s32.totalorder %v44_v20, %v1454_v57  ;;  %p1215_p0 = scmp.ne.s32.totalorder %s924_s10, %s1214_s11  ;;  %p1219_p1 = scmp.lt.s32.totalorder %s924_s10, %s924_s10 }
  0x2a   :  { %p1220_p2 = scmp.lt.s32.totalorder %s1218_s1, %s1214_s11 }
  0x2b   :  { %1037 = vmatpush3.bf16.xpose.msra.mxu0 %v235_v24 }
  0x2c   :  { %1069 = vmatpush3.bf16.xpose.msra.mxu1 %v638_v26  ;;  %1096 = vmatprep.subr.msk.bf16.mxu0 %vm203_vm0, %v1122_v25  ;;  %v1506_v25 = vadd.s32 80, %v1441_v51  ;;  %v45_v26 = vadd.s32 64, %v1441_v51  ;;  %p1221_p3 = por %p1220_p2, %p1219_p1 }
  0x2d   :  { %1104 = vmatprep.subr.msk.bf16.mxu1 %vm203_vm0, %v1123_v27 }
  0x2e   :  { %vm85_vm9 = vcmp.eq.s32.totalorder %v1506_v25, %v1454_v57  ;;  %vm83_vm10 = vcmp.eq.s32.totalorder %v45_v26, %v1454_v57  ;;  %p1222_p4 = pnand %p1221_p3, %p1215_p0 }
  0x33   :  { %1039 = vmatpush3.bf16.xpose.msra.mxu0 %v232_v28 }
  0x34   :  { %1071 = vmatpush3.bf16.xpose.msra.mxu1 %v635_v30  ;;  %1097 = vmatprep.subr.msk.bf16.mxu0 %vm203_vm0, %v1124_v29  ;;  %v1516_v30 = vadd.s32 88, %v1441_v51 }
  0x35   :  { %1105 = vmatprep.subr.msk.bf16.mxu1 %vm203_vm0, %v1125_v31 }
  0x36   :  { %vm86_vm11 = vcmp.eq.s32.totalorder %v1516_v30, %v1454_v57 }
  0x3b   :  { %1041 = vmatpush3.bf16.xpose.msra.mxu0 %v229_v32 }
  0x3c   :  { %1073 = vmatpush3.bf16.xpose.msra.mxu1 %v632_v33 }
  0x42   :  { %1043 = vmatmul.mubr.msk.bf16.vlgmr.msra.gmra.mxu0 %vm203_vm0, %v1128_v34  ;;  %v46_v34 = vadd.s32 72, %v1441_v51 }
  0x43   :  { %1075 = vmatmul.mubr.msk.bf16.vlgmr.msra.gmra.mxu1 %vm203_vm0, %v1129_v35  ;;  %1046 = vmatprep.mubr.msk.bf16.mxu0 %vm203_vm0, %v1130_v36  ;;  %v1525_v35 = vadd.s32 96, %v1441_v51 }
  0x44   :  { %1078 = vmatprep.mubr.msk.bf16.mxu1 %vm203_vm0, %v1131_v37  ;;  %vm84_vm12 = vcmp.eq.s32.totalorder %v46_v34, %v1454_v57 }
  0x45   :  { %vm87_vm13 = vcmp.eq.s32.totalorder %v1525_v35, %v1454_v57 }
  0x4a   :  { %1047 = vmatmul.mubr.msk.bf16.gmra.mxu0 %vm203_vm0, %v1132_v38 }
  0x4b   :  { %1079 = vmatmul.mubr.msk.bf16.gmra.mxu1 %vm203_vm0, %v1133_v39  ;;  %1050 = vmatprep.mubr.msk.bf16.mxu0 %vm203_vm0, %v1134_v40  ;;  %v1534_v39 = vadd.s32 104, %v1441_v51 }
  0x4c   :  { %1082 = vmatprep.mubr.msk.bf16.mxu1 %vm203_vm0, %v1135_v41 }
  0x4d   :  { %vm88_vm14 = vcmp.eq.s32.totalorder %v1534_v39, %v1454_v57 }
  0x52   :  { %1051 = vmatmul.mubr.msk.bf16.gmra.mxu0 %vm203_vm0, %v1136_v42 }
  0x53   :  { %1083 = vmatmul.mubr.msk.bf16.gmra.mxu1 %vm203_vm0, %v1137_v43  ;;  %1054 = vmatprep.mubr.msk.bf16.mxu0 %vm203_vm0, %v1138_v44 }
  0x54   :  { %1086 = vmatprep.mubr.msk.bf16.mxu1 %vm203_vm0, %v1139_v45 }
  0x5a   :  { %1055 = vmatmul.mubr.msk.bf16.gmra.mxu0 %vm203_vm0, %v1140_v46  ;;  %v1552_v46 = vadd.s32 112, %v1441_v51 }
  0x5b   :  { %1087 = vmatmul.mubr.msk.bf16.gmra.mxu1 %vm203_vm0, %v1141_v47  ;;  %vm90_vm0 = vcmp.eq.s32.totalorder %v1568_v59, %v1454_v57 }
  0x5c   :  { %vm89_vm15 = vcmp.eq.s32.totalorder %v1552_v46, %v1454_v57 }
 0x102   :  { %v1443_v52 = vpop.f32.mrf.mxu0 }
 0x103   :  { %v1446_v54 = vpop.f32.mrf.mxu1  ;;  %v457_v8 = vsel %vm77_vm3, %v1443_v52, 0.0 }
 0x104   :  { %v1449_v56 = vpop.f32.mrf.mxu0  ;;  %v860_v11 = vsel %vm77_vm3, %v1446_v54, 0.0 }
 0x105   :  { %v1456_v58 = vpop.f32.mrf.mxu1  ;;  %v455_v0 = vsel %vm75_vm1, %v1449_v56, 0.0 }
 0x106   :  { %v1461_v60 = vpop.f32.mrf.mxu0  ;;  %v858_v3 = vsel %vm75_vm1, %v1456_v58, 0.0 }
 0x107   :  { %v1464_v61 = vpop.f32.mrf.mxu1  ;;  %v458_v15 = vsel %vm78_vm4, %v1461_v60, 0.0 }
 0x108   :  { %v1467_v62 = vpop.f32.mrf.mxu0  ;;  %v861_v18 = vsel %vm78_vm4, %v1464_v61, 0.0 }
 0x109   :  { %v456_v1 = vsel %vm76_vm2, %v1467_v62, 0.0  ;;  %v1473_v2 = vpop.f32.mrf.mxu1 }
 0x10a   :  { %v471_v4 = vadd.f32 %v456_v1, %v455_v0  ;;  %v859_v5 = vsel %vm76_vm2, %v1473_v2, 0.0  ;;  %v1477_v6 = vpop.f32.mrf.mxu0 }
 0x10b   :  { %v874_v9 = vadd.f32 %v859_v5, %v858_v3  ;;  %v1481_v10 = vpop.f32.mrf.mxu1  ;;  %v461_v40 = vsel %vm81_vm7, %v1477_v6, 0.0  ;;  %v351_v63 = vmax.f32 %v1443_v52, %v1477_v6 }
 0x10c   :  { %v472_v12 = vadd.f32 %v471_v4, %v457_v8  ;;  %v1486_v14 = vpop.f32.mrf.mxu0  ;;  %v864_v43 = vsel %vm81_vm7, %v1481_v10, 0.0  ;;  %v754_v0 = vmax.f32 %v1446_v54, %v1481_v10 }
 0x10d   :  { %v875_v16 = vadd.f32 %v874_v9, %v860_v11  ;;  %v1491_v17 = vpop.f32.mrf.mxu1  ;;  %v459_v22 = vsel %vm79_vm5, %v1486_v14, 0.0  ;;  %v349_v5 = vmax.f32 %v1449_v56, %v1486_v14 }
 0x10e   :  { %v473_v19 = vadd.f32 %v472_v12, %v458_v15  ;;  %v1497_v21 = vpop.f32.mrf.mxu0  ;;  %v862_v28 = vsel %vm79_vm5, %v1491_v17, 0.0  ;;  %v752_v7 = vmax.f32 %v1456_v58, %v1491_v17 }
 0x10f   :  { %v876_v23 = vadd.f32 %v875_v16, %v861_v18  ;;  %v1503_v24 = vpop.f32.mrf.mxu1  ;;  %v462_v47 = vsel %vm82_vm8, %v1497_v21, 0.0  ;;  %v352_v12 = vmax.f32 %v1461_v60, %v1497_v21 }
 0x110   :  { %v474_v27 = vadd.f32 %v473_v19, %v459_v22  ;;  %v1513_v29 = vpop.f32.mrf.mxu0  ;;  %v865_v50 = vsel %vm82_vm8, %v1503_v24, 0.0  ;;  %v755_v13 = vmax.f32 %v1464_v61, %v1503_v24 }
 0x111   :  { %v877_v31 = vadd.f32 %v876_v23, %v862_v28  ;;  %v460_v32 = vsel %vm80_vm6, %v1513_v29, 0.0  ;;  %v1521_v33 = vpop.f32.mrf.mxu1  ;;  %v350_v19 = vmax.f32 %v1467_v62, %v1513_v29 }
 0x112   :  { %v475_v36 = vadd.f32 %v474_v27, %v460_v32  ;;  %v863_v37 = vsel %vm80_vm6, %v1521_v33, 0.0  ;;  %v1531_v38 = vpop.f32.mrf.mxu0  ;;  %v753_v20 = vmax.f32 %v1473_v2, %v1521_v33 }
 0x113   :  { %v878_v41 = vadd.f32 %v877_v31, %v863_v37  ;;  %v1541_v42 = vpop.f32.mrf.mxu1  ;;  %v355_v27 = vmax.f32 %v351_v63, %v1531_v38  ;;  %v465_v28 = vsel %vm85_vm9, %v1531_v38, 0.0 }
 0x114   :  { %v476_v44 = vadd.f32 %v475_v36, %v461_v40  ;;  %v1547_v45 = vpop.f32.mrf.mxu0  ;;  %v758_v31 = vmax.f32 %v754_v0, %v1541_v42  ;;  %v868_v34 = vsel %vm85_vm9, %v1541_v42, 0.0 }
 0x115   :  { %v879_v48 = vadd.f32 %v878_v41, %v864_v43  ;;  %v1557_v49 = vpop.f32.mrf.mxu1  ;;  %v463_v1 = vsel %vm83_vm10, %v1547_v45, 0.0  ;;  %v353_v37 = vmax.f32 %v349_v5, %v1547_v45 }
 0x116   :  { %v477_v53 = vadd.f32 %v476_v44, %v462_v47  ;;  %v1565_v55 = vpop.f32.mrf.mxu0  ;;  %v866_v9 = vsel %vm83_vm10, %v1557_v49, 0.0  ;;  %v756_v40 = vmax.f32 %v752_v7, %v1557_v49 }
 0x117   :  { %v880_v3 = vadd.f32 %v879_v48, %v865_v50  ;;  %v1579_v4 = vpop.f32.mrf.mxu1  ;;  %v356_v44 = vmax.f32 %v352_v12, %v1565_v55  ;;  %v466_v47 = vsel %vm86_vm11, %v1565_v55, 0.0 }
 0x118   :  { %v478_v8 = vadd.f32 %v477_v53, %v463_v1  ;;  %v1588_v11 = vpop.f32.mrf.mxu0  ;;  %v759_v48 = vmax.f32 %v755_v13, %v1579_v4  ;;  %v869_v25 = vsel %vm86_vm11, %v1579_v4, 0.0 }
 0x119   :  { %v881_v15 = vadd.f32 %v880_v3, %v866_v9  ;;  %v464_v16 = vsel %vm84_vm12, %v1588_v11, 0.0  ;;  %v1599_v18 = vpop.f32.mrf.mxu1  ;;  %v354_v63 = vmax.f32 %v350_v19, %v1588_v11 }
 0x11a   :  { %v479_v22 = vadd.f32 %v478_v8, %v464_v16  ;;  %v867_v23 = vsel %vm84_vm12, %v1599_v18, 0.0  ;;  %v1608_v26 = vpop.f32.mrf.mxu0  ;;  %v757_v0 = vmax.f32 %v753_v20, %v1599_v18 }
 0x11b   :  { %v882_v32 = vadd.f32 %v881_v15, %v867_v23  ;;  %v1618_v36 = vpop.f32.mrf.mxu1  ;;  %v359_v5 = vmax.f32 %v355_v27, %v1608_v26 }
 0x11c   :  { %v480_v41 = vadd.f32 %v479_v22, %v465_v28  ;;  %v1626_v43 = vpop.f32.mrf.mxu0  ;;  %v762_v30 = vmax.f32 %v758_v31, %v1618_v36 }
 0x11d   :  { %v883_v50 = vadd.f32 %v882_v32, %v868_v34  ;;  %v1634_v53 = vpop.f32.mrf.mxu1  ;;  %v467_v7 = vsel %vm87_vm13, %v1626_v43, 0.0  ;;  %v357_v20 = vmax.f32 %v353_v37, %v1626_v43  ;;  %v469_v37 = vsel %vm89_vm15, %v1608_v26, 0.0 }
 0x11e   :  { %v481_v1 = vadd.f32 %v480_v41, %v466_v47  ;;  %v1642_v3 = vpop.f32.mrf.mxu0  ;;  %v870_v15 = vsel %vm87_vm13, %v1634_v53, 0.0  ;;  %v760_v31 = vmax.f32 %v756_v40, %v1634_v53  ;;  %v872_v40 = vsel %vm89_vm15, %v1618_v36, 0.0 }
 0x11f   :  { %v884_v8 = vadd.f32 %v883_v50, %v869_v25  ;;  %v360_v9 = vmax.f32 %v356_v44, %v1642_v3  ;;  %v1650_v12 = vpop.f32.mrf.mxu1  ;;  %v470_v39 = vsel %vm90_vm0, %v1642_v3, 0.0 }
 0x120   :  { %v482_v13 = vadd.f32 %v481_v1, %v467_v7  ;;  %v763_v16 = vmax.f32 %v759_v48, %v1650_v12  ;;  %v1658_v19 = vpop.f32.mrf.mxu0  ;;  %v873_v1 = vsel %vm90_vm0, %v1650_v12, 0.0 }
 0x121   :  { %v885_v22 = vadd.f32 %v884_v8, %v870_v15  ;;  %v358_v23 = vmax.f32 %v354_v63, %v1658_v19  ;;  %v468_v27 = vsel %vm88_vm14, %v1658_v19, 0.0  ;;  %v1666_v28 = vpop.f32.mrf.mxu1  ;;  %v362_v41 = vmax.f32 %v359_v5, %v360_v9 }
 0x122   :  { %v483_v35 = vadd.f32 %v482_v13, %v468_v27  ;;  %v761_v32 = vmax.f32 %v757_v0, %v1666_v28  ;;  %v871_v34 = vsel %vm88_vm14, %v1666_v28, 0.0  ;;  %v765_v48 = vmax.f32 %v762_v30, %v763_v16 }
 0x123   :  { %v361_v44 = vmax.f32 %v357_v20, %v358_v23  ;;  %v886_v47 = vadd.f32 %v885_v22, %v871_v34 }
 0x124   :  { %v484_v50 = vadd.f32 %v483_v35, %v469_v37  ;;  %v764_v25 = vmax.f32 %v760_v31, %v761_v32 }
 0x125   :  { %v363_v63 = vmax.f32 %v361_v44, %v362_v41  ;;  %v887_v0 = vadd.f32 %v886_v47, %v872_v40  ;;  %v1690_v41 = vld [vmem:[#allocation2] sm:$0x1] }
 0x126   :  { %v485_v5 = vadd.f32 %v484_v50, %v470_v39  ;;  %v766_v7 = vmax.f32 %v764_v25, %v765_v48  ;;  %v380_v48 = vsub.s32 0, %v1441_v51  ;;  %v454_v50 = vld [vmem:[#allocation4] sm:$0x1]  ;;  %v1693_v25 = vld [vmem:[#allocation5] sm:$0x1] }
 0x127   :  { %v364_v8 = vrot.slane %v363_v63, 4  ;;  %v888_v46 = vadd.f32 %v887_v0, %v873_v1  ;;  %v857_v1 = vld [vmem:[#allocation7] sm:$0x1] }
 0x128   :  { %v486_v9 = vrot.slane %v485_v5, 4  ;;  %v767_v30 = vrot.slane %v766_v7, 4 }
 0x129   :  { %v365_v13 = vmax.f32 %v363_v63, %v364_v8  ;;  %v889_v15 = vrot.slane %v888_v46, 4 }
 0x12a   :  { %v487_v16 = vadd.f32 %v486_v9, %v485_v5  ;;  %v768_v20 = vmax.f32 %v766_v7, %v767_v30 }
 0x12b   :  { %v366_v22 = vrot.slane %v365_v13, 2  ;;  %v890_v23 = vadd.f32 %v889_v15, %v888_v46 }
 0x12c   :  { %v488_v27 = vrot.slane %v487_v16, 2  ;;  %v769_v31 = vrot.slane %v768_v20, 2 }
 0x12d   :  { %v367_v35 = vmax.f32 %v365_v13, %v366_v22  ;;  %v891_v32 = vrot.slane %v890_v23, 2 }
 0x12e   :  { %v489_v34 = vadd.f32 %v488_v27, %v487_v16  ;;  %v770_v37 = vmax.f32 %v768_v20, %v769_v31 }
 0x12f   :  { %v368_v57 = vrot.slane %v367_v35, 1  ;;  %v892_v59 = vadd.f32 %v891_v32, %v890_v23 }
 0x130   :  { %v490_v44 = vrot.slane %v489_v34, 1  ;;  %v771_v47 = vrot.slane %v770_v37, 1 }
 0x131   :  { %v369_v40 = vmax.f32 %v367_v35, %v368_v57  ;;  %v893_v39 = vrot.slane %v892_v59, 1 }
 0x132   :  { %v491_v63 = vadd.f32 %v490_v44, %v489_v34  ;;  %v772_v0 = vmax.f32 %v770_v37, %v771_v47 }
 0x133   :  { %v1696_v5 = vmax.f32 %v1690_v41, %v369_v40  ;;  %v894_v7 = vadd.f32 %v893_v39, %v892_v59 }
 0x134   :  { %v492_v8 = vadd.f32 %v491_v63, %v454_v50  ;;  %v1699_v46 = vmax.f32 %v1693_v25, %v772_v0 }
 0x135   :  { %v1702_v9 = vrot.slane %v1696_v5, %v380_v48  ;;  %494 = vst [vmem:[#allocation2] sm:$0x1] %v1696_v5  ;;  %v895_v51 = vadd.f32 %v894_v7, %v857_v1 }
 0x136   :  { %493 = vst [vmem:[#allocation4] sm:$0x1] %v492_v8  ;;  %897 = vst [vmem:[#allocation5] sm:$0x1] %v1699_v46  ;;  %v1723_v32 = vrot.slane %v1699_v46, %v380_v48 }
 0x137   :  { %v383_v30 = vsub.f32 %v1449_v56, %v1702_v9  ;;  %v384_v13 = vsub.f32 %v1467_v62, %v1702_v9  ;;  %896 = vst [vmem:[#allocation7] sm:$0x1] %v895_v51  ;;  %v385_v15 = vsub.f32 %v1443_v52, %v1702_v9  ;;  %v386_v16 = vsub.f32 %v1461_v60, %v1702_v9 }
 0x138   :  { %v387_v23 = vsub.f32 %v1486_v14, %v1702_v9  ;;  %v388_v56 = vsub.f32 %v1513_v29, %v1702_v9  ;;  %v389_v62 = vsub.f32 %v1477_v6, %v1702_v9  ;;  %v390_v60 = vsub.f32 %v1497_v21, %v1702_v9 }
 0x139   :  { %v399_v20 = vmul.f32 1.442695, %v383_v30  ;;  %v401_v22 = vmul.f32 1.442695, %v384_v13  ;;  %v403_v27 = vmul.f32 1.442695, %v385_v15  ;;  %v391_v14 = vsub.f32 %v1547_v45, %v1702_v9 }
 0x13a   :  { %v405_v31 = vmul.f32 1.442695, %v386_v16  ;;  %v407_v52 = vmul.f32 1.442695, %v387_v23  ;;  %v409_v35 = vmul.f32 1.442695, %v388_v56  ;;  %v392_v34 = vsub.f32 %v1588_v11, %v1702_v9 }
 0x13b   :  { %1142 = vpow2.f32 %v399_v20  ;;  %v411_v29 = vmul.f32 1.442695, %v389_v62  ;;  %v413_v6 = vmul.f32 1.442695, %v390_v60  ;;  %v786_v37 = vsub.f32 %v1456_v58, %v1723_v32 }
 0x13c   :  { %1144 = vpow2.f32 %v401_v22  ;;  %v787_v21 = vsub.f32 %v1473_v2, %v1723_v32  ;;  %v393_v57 = vsub.f32 %v1531_v38, %v1702_v9  ;;  %v415_v59 = vmul.f32 1.442695, %v391_v14 }
 0x13d   :  { %1146 = vpow2.f32 %v403_v27  ;;  %v417_v44 = vmul.f32 1.442695, %v392_v34  ;;  %v788_v45 = vsub.f32 %v1446_v54, %v1723_v32  ;;  %v394_v11 = vsub.f32 %v1565_v55, %v1702_v9 }
 0x13e   :  { %1148 = vpow2.f32 %v405_v31  ;;  %v802_v40 = vmul.f32 1.442695, %v786_v37  ;;  %v789_v58 = vsub.f32 %v1464_v61, %v1723_v32  ;;  %v804_v2 = vmul.f32 1.442695, %v787_v21 }
 0x13f   :  { %1150 = vpow2.f32 %v407_v52  ;;  %v395_v38 = vsub.f32 %v1626_v43, %v1702_v9  ;;  %v419_v50 = vmul.f32 1.442695, %v393_v57  ;;  %v790_v54 = vsub.f32 %v1491_v17, %v1723_v32 }
 0x140   :  { %1152 = vpow2.f32 %v409_v35  ;;  %v806_v0 = vmul.f32 1.442695, %v788_v45  ;;  %v396_v55 = vsub.f32 %v1658_v19, %v1702_v9  ;;  %v421_v1 = vmul.f32 1.442695, %v394_v11 }
 0x141   :  { %1154 = vpow2.f32 %v411_v29  ;;  %v791_v8 = vsub.f32 %v1521_v33, %v1723_v32  ;;  %v808_v43 = vmul.f32 1.442695, %v789_v58  ;;  %v397_v51 = vsub.f32 %v1608_v26, %v1702_v9 }
 0x142   :  { %1156 = vpow2.f32 %v413_v6  ;;  %v423_v30 = vmul.f32 1.442695, %v395_v38  ;;  %v792_v15 = vsub.f32 %v1481_v10, %v1723_v32  ;;  %v810_v19 = vmul.f32 1.442695, %v790_v54 }
 0x143   :  { %1158 = vpow2.f32 %v415_v59  ;;  %v398_v16 = vsub.f32 %v1642_v3, %v1702_v9  ;;  %v425_v20 = vmul.f32 1.442695, %v396_v55  ;;  %v793_v23 = vsub.f32 %v1503_v24, %v1723_v32 }
 0x144   :  { %1160 = vpow2.f32 %v417_v44  ;;  %v812_v26 = vmul.f32 1.442695, %v791_v8  ;;  %v427_v27 = vmul.f32 1.442695, %v397_v51  ;;  %v794_v10 = vsub.f32 %v1557_v49, %v1723_v32 }
 0x145   :  { %1162 = vpow2.f32 %v802_v40  ;;  %v814_v62 = vmul.f32 1.442695, %v792_v15  ;;  %v429_v3 = vmul.f32 1.442695, %v398_v16  ;;  %v795_v60 = vsub.f32 %v1599_v18, %v1723_v32 }
 0x146   :  { %1164 = vpow2.f32 %v804_v2  ;;  %v816_v24 = vmul.f32 1.442695, %v793_v23  ;;  %v796_v29 = vsub.f32 %v1541_v42, %v1723_v32  ;;  %v818_v34 = vmul.f32 1.442695, %v794_v10 }
 0x147   :  { %1166 = vpow2.f32 %v419_v50  ;;  %v797_v21 = vsub.f32 %v1579_v4, %v1723_v32  ;;  %v820_v57 = vmul.f32 1.442695, %v795_v60  ;;  %v372_v59 = vsub.f32 %v1690_v41, %v1696_v5 }
 0x148   :  { %v1143_v47 = vpop.eup %1142  ;;  %1168 = vpow2.f32 %v806_v0  ;;  %v798_v42 = vsub.f32 %v1634_v53, %v1723_v32  ;;  %v799_v4 = vsub.f32 %v1666_v28, %v1723_v32 }
 0x149   :  { %v1145_v48 = vpop.eup %1144  ;;  %1170 = vpow2.f32 %v421_v1  ;;  %v824_v2 = vmul.f32 1.442695, %v797_v21 }
 0x14a   :  { %v431_v39 = vadd.f32 %v1145_v48, %v1143_v47  ;;  %v1147_v63 = vpop.eup %1146  ;;  %1172 = vpow2.f32 %v808_v43  ;;  %v822_v47 = vmul.f32 1.442695, %v796_v29  ;;  %v826_v53 = vmul.f32 1.442695, %v798_v42 }
 0x14b   :  { %v1149_v61 = vpop.eup %1148  ;;  %1174 = vpow2.f32 %v423_v30  ;;  %v828_v28 = vmul.f32 1.442695, %v799_v4 }
 0x14c   :  { %v432_v7 = vadd.f32 %v1147_v63, %v431_v39  ;;  %v1151_v17 = vpop.eup %1150  ;;  %1176 = vpow2.f32 %v810_v19  ;;  %v373_v39 = vmul.f32 1.442695, %v372_v59  ;;  %v800_v63 = vsub.f32 %v1618_v36, %v1723_v32 }
 0x14d   :  { %v1153_v22 = vpop.eup %1152  ;;  %1178 = vpow2.f32 %v425_v20 }
 0x14e   :  { %v433_v13 = vadd.f32 %v1149_v61, %v432_v7  ;;  %v1155_v31 = vpop.eup %1154  ;;  %1180 = vpow2.f32 %v812_v26  ;;  %v801_v7 = vsub.f32 %v1650_v12, %v1723_v32  ;;  %v830_v30 = vmul.f32 1.442695, %v800_v63 }
 0x14f   :  { %v1157_v52 = vpop.eup %1156  ;;  %1182 = vpow2.f32 %v427_v27 }
 0x150   :  { %v434_v33 = vadd.f32 %v1151_v17, %v433_v13  ;;  %v1159_v14 = vpop.eup %1158  ;;  %1184 = vpow2.f32 %v814_v62  ;;  %v832_v19 = vmul.f32 1.442695, %v801_v7 }
 0x151   :  { %v1161_v49 = vpop.eup %1160  ;;  %1186 = vpow2.f32 %v429_v3 }
 0x152   :  { %v435_v56 = vadd.f32 %v1153_v22, %v434_v33  ;;  %v1163_v37 = vpop.eup %1162  ;;  %1188 = vpow2.f32 %v816_v24  ;;  %v375_v24 = vld [vmem:[#allocation3] sm:$0x1] }
 0x153   :  { %v1165_v18 = vpop.eup %1164  ;;  %1190 = vpow2.f32 %v818_v34 }
 0x154   :  { %v436_v9 = vadd.f32 %v1155_v31, %v435_v56  ;;  %v1167_v45 = vpop.eup %1166  ;;  %v834_v11 = vadd.f32 %v1165_v18, %v1163_v37  ;;  %1192 = vpow2.f32 %v820_v57  ;;  %v775_v56 = vsub.f32 %v1693_v25, %v1699_v46 }
 0x155   :  { %v1169_v40 = vpop.eup %1168  ;;  %1194 = vpow2.f32 %v822_v47 }
 0x156   :  { %v437_v35 = vadd.f32 %v1157_v52, %v436_v9  ;;  %v1171_v58 = vpop.eup %1170  ;;  %v835_v38 = vadd.f32 %v1169_v40, %v834_v11  ;;  %1196 = vpow2.f32 %v824_v2 }
 0x157   :  { %v1173_v50 = vpop.eup %1172  ;;  %1198 = vpow2.f32 %v373_v39 }
 0x158   :  { %v438_v6 = vadd.f32 %v1159_v14, %v437_v35  ;;  %v1175_v5 = vpop.eup %1174  ;;  %v836_v54 = vadd.f32 %v1173_v50, %v835_v38  ;;  %1200 = vpow2.f32 %v826_v53  ;;  %v776_v35 = vmul.f32 1.442695, %v775_v56 }
 0x159   :  { %v1177_v0 = vpop.eup %1176  ;;  %1202 = vpow2.f32 %v828_v28 }
 0x15a   :  { %v439_v44 = vadd.f32 %v1161_v49, %v438_v6  ;;  %v1179_v1 = vpop.eup %1178  ;;  %v837_v61 = vadd.f32 %v1177_v0, %v836_v54  ;;  %1204 = vpow2.f32 %v830_v30  ;;  %v901_v54 = vld [vmem:[#allocation4] sm:$0x1] }
 0x15b   :  { %v1181_v8 = vpop.eup %1180  ;;  %1206 = vpow2.f32 %v832_v19 }
 0x15c   :  { %v440_v48 = vadd.f32 %v1167_v45, %v439_v44  ;;  %v1183_v51 = vpop.eup %1182  ;;  %v838_v13 = vadd.f32 %v1181_v8, %v837_v61  ;;  %1208 = vpow2.f32 %v776_v35 }
 0x15d   :  { %v1185_v36 = vpop.eup %1184 }
 0x15e   :  { %v441_v41 = vadd.f32 %v1171_v58, %v440_v48  ;;  %v1187_v15 = vpop.eup %1186  ;;  %v839_v16 = vadd.f32 %v1185_v36, %v838_v13  ;;  %v778_v58 = vld [vmem:[#allocation6] sm:$0x1] }
 0x15f   :  { %v1189_v20 = vpop.eup %1188 }
 0x160   :  { %v442_v55 = vadd.f32 %v1175_v5, %v441_v41  ;;  %v840_v12 = vadd.f32 %v1189_v20, %v839_v16  ;;  %v1191_v32 = vpop.eup %1190  ;;  %v902_v5 = vld [vmem:[#allocation2] sm:$0x1] }
 0x161   :  { %v1193_v26 = vpop.eup %1192 }
 0x162   :  { %v443_v43 = vadd.f32 %v1179_v1, %v442_v55  ;;  %v841_v23 = vadd.f32 %v1191_v32, %v840_v12  ;;  %v1195_v10 = vpop.eup %1194 }
 0x163   :  { %v1197_v9 = vpop.eup %1196 }
 0x164   :  { %v444_v17 = vadd.f32 %v1183_v51, %v443_v43  ;;  %v842_v31 = vadd.f32 %v1193_v26, %v841_v23  ;;  %v1199_v60 = vpop.eup %1198 }
 0x165   :  { %v1201_v29 = vpop.eup %1200  ;;  %v376_v37 = vmul.f32 %v1199_v60, %v375_v24 }
 0x166   :  { %v445_v33 = vadd.f32 %v1187_v15, %v444_v17  ;;  %v843_v3 = vadd.f32 %v1195_v10, %v842_v31  ;;  %v1203_v6 = vpop.eup %1202 }
 0x167   :  { %v1205_v18 = vpop.eup %1204 }
 0x168   :  { %v446_v22 = vrot.slane %v445_v33, 4  ;;  %v844_v14 = vadd.f32 %v1197_v9, %v843_v3  ;;  %v1207_v59 = vpop.eup %1206 }
 0x169   :  { %v1209_v48 = vpop.eup %1208 }
 0x16a   :  { %v447_v27 = vadd.f32 %v446_v22, %v445_v33  ;;  %v845_v49 = vadd.f32 %v1201_v29, %v844_v14  ;;  %v779_v2 = vmul.f32 %v1209_v48, %v778_v58 }
 0x16c   :  { %v448_v62 = vrot.slane %v447_v27, 2  ;;  %v846_v57 = vadd.f32 %v1203_v6, %v845_v49 }
 0x16e   :  { %v449_v52 = vadd.f32 %v448_v62, %v447_v27  ;;  %v847_v46 = vadd.f32 %v1205_v18, %v846_v57 }
 0x170   :  { %v450_v34 = vrot.slane %v449_v52, 1  ;;  %v848_v44 = vadd.f32 %v1207_v59, %v847_v46 }
 0x172   :  { %v451_v21 = vadd.f32 %v450_v34, %v449_v52  ;;  %v849_v45 = vrot.slane %v848_v44, 4 }
 0x174   :  { %v452_v25 = vadd.f32 %v451_v21, %v376_v37  ;;  %v850_v42 = vadd.f32 %v849_v45, %v848_v44 }
 0x176   :  { %453 = vst [vmem:[#allocation3] sm:$0x1] %v452_v25  ;;  %v851_v47 = vrot.slane %v850_v42, 2 }
 0x178   :  { %v852_v40 = vadd.f32 %v851_v47, %v850_v42 }
 0x17a   :  { %v853_v4 = vrot.slane %v852_v40, 1 }
 0x17c   :  { %v854_v38 = vadd.f32 %v853_v4, %v852_v40 }
 0x17d   :  { %v903_v11 = vld [vmem:[#allocation3] sm:$0x1] }
 0x17e   :  { %1210 = vlog2.f32 %v903_v11  ;;  %v855_v50 = vadd.f32 %v854_v38, %v779_v2 }
 0x180   :  { %856 = vst [vmem:[#allocation6] sm:$0x1] %v855_v50 }
 0x187   :  { %v911_v53 = vld [vmem:[#allocation6] sm:$0x1] }
 0x188   :  { %1212 = vlog2.f32 %v911_v53 }
 0x18b   :  { %v1211_v39 = vpop.eup %1210 }
 0x18c   :  { %v905_v41 = vmul.f32 0.6931472, %v1211_v39 }
 0x18e   :  { %v906_v63 = vadd.f32 %v905_v41, %v902_v5 }
 0x190   :  { %v907_v0 = vsub.f32 %v901_v54, %v906_v63 }
 0x192   :  { %908 = vst [vmem:[#allocation8] sm:$0x1] %v907_v0 }
 0x193   :  { %1225 = shalt.err (!%p1222_p4)
}
 0x194   :  { %926 = dma.vmem_to_hbm [thread:$0]  %s924_s10, 16, %s1788_s5, [#allocation9]   ;;  %v910_v7 = vld [vmem:[#allocation5] sm:$0x1]  ;;  %v909_v61 = vld [vmem:[#allocation7] sm:$0x1] }
 0x195   :  { %v1213_v55 = vpop.eup %1212  ;;  %s1261_s14 = smov [#allocation10]  }
 0x196   :  { %v913_v1 = vmul.f32 0.6931472, %v1213_v55  ;;  %s933_s15 = sshll.u32 %s1261_s14, 4  ;;  %s934_s15 = int_to_ptr.vmem [resolvable:$true] %s933_s15 }
 0x197   :  { %s1234_s16 = scalar_lea.vmem %s934_s15, 16  ;;  %s1238_s17 = scalar_lea.vmem %s934_s15, 32 }
 0x198   :  { %v914_v28 = vadd.f32 %v913_v1, %v910_v7  ;;  %p1235_p5 = scmp.ne.s32.totalorder %s934_s15, %s1234_s16  ;;  %p1239_p6 = scmp.lt.s32.totalorder %s934_s15, %s934_s15 }
 0x199   :  { %p1240_p7 = scmp.lt.s32.totalorder %s1238_s17, %s1234_s16 }
 0x19a   :  { %v915_v8 = vsub.f32 %v909_v61, %v914_v28 }
 0x19b   :  { %p1241_p8 = por %p1240_p7, %p1239_p6 }
 0x19c   :  { %916 = vst [vmem:[#allocation10] sm:$0x1] %v915_v8 }
 0x19d   :  { %p1242_p9 = pnand %p1241_p8, %p1235_p5 }
 0x19f   :  { %1245 = shalt.err (!%p1242_p9)
}
 0x1a0   :  { %936 = dma.vmem_to_hbm [thread:$0]  %s934_s15, 16, %s1789_s6, [#allocation11]  }
 0x1a1   :  { %1254 = dma.done.wait [#allocation9], 16  }
 0x1a2   :  { %1255 = vsyncadd [#allocation9], 4294967280 }
 0x1a3   :  { %1256 = dma.done.wait [#allocation11], 16  }
 0x1a4   :  { %1257 = vsyncadd [#allocation11], 4294967280 }
 0x1a5   :  { %943 = vsyncpa [#allocation9], 1 }
 0x1a6   :  { %944 = vsyncpa [#allocation11], 1 }

</bundles_post_ra>
